<compile_context>
chip_gen: v6e
topology: v6e:2x2x1
jax: 0.10.0
libtpu: 0.0.40
codegen_flags: <defaults>
</compile_context>

<pallas_src>
import functools
import math

import jax
import jax.numpy as jnp
from jax import lax
from jax.experimental import pallas as pl
from jax.experimental.pallas import tpu as pltpu


# ------------------------------ VMEM budget --------------------------------- #

def _derive_vmem_limit():
    """Scoped-VMEM limit: ~70% of per-core VMEM, capped; safe fallback = v7x (64 MiB)."""
    phys = 64 << 20
    try:
        info = pltpu.get_tpu_info()
        for name in ("vmem_capacity_bytes", "vmem_size_bytes", "vmem_bytes"):
            val = getattr(info, name, None)
            if val:
                phys = int(val)
                break
    except Exception:  # no TPU info available -> conservative default
        pass
    phys = max(min(phys, 128 << 20), 32 << 20)
    return min(int(phys * 0.70), 100 << 20)


_VMEM_LIMIT = _derive_vmem_limit()
_RESIDENT_BUDGET = int(_VMEM_LIMIT * 0.85)     # headroom for pipeline bookkeeping


def _pick_tile(dim, cap, mults=(256, 128)):
    """Largest tile <= cap dividing `dim`, preferring the largest multiple in `mults`
    (256 first: full-width passes on the 256x256 v6e/v7x MXU); else the full dim."""
    if dim <= cap:
        return dim
    for mult in mults:
        t = (cap // mult) * mult
        while t >= mult:
            if dim % t == 0:
                return t
            t -= mult
    return dim


# ------------------------ weight-resident linear ----------------------------- #

def _linear_resident_kernel(x_ref, w_ref, b_ref, o_ref):
    # Whole weight resident in VMEM; one (tm, N) output slab per grid step, no K axis.
    acc = lax.dot_general(
        x_ref[...], w_ref[...],
        dimension_numbers=(((1,), (1,)), ((), ())),
        preferred_element_type=jnp.float32)
    o_ref[...] = (acc + b_ref[...]).astype(o_ref.dtype)


def _linear_resident_chunked_kernel(x_ref, w_ref, b_ref, o_ref, *, n_chunks, width):
    # Same GEMM but the output is written as (n_chunks, tm, width) so fused QKV / KV
    # projections yield contiguous per-operand tensors (no strided reads downstream).
    acc = lax.dot_general(
        x_ref[...], w_ref[...],
        dimension_numbers=(((1,), (1,)), ((), ())),
        preferred_element_type=jnp.float32) + b_ref[...]
    for c in range(n_chunks):
        o_ref[c] = acc[:, c * width:(c + 1) * width].astype(o_ref.dtype)


def _resident_row_tile(M, K, N, dsize, budget):
    """Row tile for the weight-resident GEMM, or None if the weight cannot stay resident."""
    fixed = 2 * N * K * dsize + 4 * N                  # double-buffered weight + f32 bias
    if fixed > budget:
        return None
    per_row = 2 * K * dsize + 2 * N * dsize + 4 * N    # x / out double buffers + f32 acc
    cands = []
    if M <= 1024:
        cands.append(M)                                # full-M block (any M) if it fits
    t = min((M // 8) * 8, 1024)
    while t >= 8:
        cands.append(t)
        t = ((t // 2) // 8) * 8
    for tm in cands:
        if tm >= 1 and fixed + tm * per_row <= budget:
            return tm
    return None


def _linear_resident(x, w, b, tm, *, n_chunks=1):
    M, K = x.shape
    N = w.shape[0]
    if n_chunks == 1:
        out_shape = jax.ShapeDtypeStruct((M, N), x.dtype)
        out_spec = pl.BlockSpec((tm, N), lambda i: (i, 0))
        kernel = _linear_resident_kernel
    else:
        width = N // n_chunks
        out_shape = jax.ShapeDtypeStruct((n_chunks, M, width), x.dtype)
        out_spec = pl.BlockSpec((n_chunks, tm, width), lambda i: (0, i, 0))
        kernel = functools.partial(_linear_resident_chunked_kernel,
                                   n_chunks=n_chunks, width=width)
    return pl.pallas_call(
        kernel,
        grid=(pl.cdiv(M, tm),),
        in_specs=[
            pl.BlockSpec((tm, K), lambda i: (i, 0)),
            pl.BlockSpec((N, K), lambda i: (0, 0)),     # constant block -> fetched once
            pl.BlockSpec((1, N), lambda i: (0, 0)),
        ],
        out_specs=out_spec,
        out_shape=out_shape,
        compiler_params=pltpu.CompilerParams(
            dimension_semantics=("parallel",),
            vmem_limit_bytes=_VMEM_LIMIT),
    )(x, w, b.astype(jnp.float32).reshape(1, N))


# ----------------------- tiled K-reduction fallback -------------------------- #

def _linear_tiled_kernel(x_ref, w_ref, b_ref, o_ref, acc_ref):
    @pl.when(pl.program_id(2) == 0)
    def _init():
        acc_ref[...] = jnp.zeros(acc_ref.shape, acc_ref.dtype)

    # x:(tm,tk) contracted with w:(tn,tk) on the last dim of both -> (tm,tn); no .T.
    acc_ref[...] += lax.dot_general(
        x_ref[...], w_ref[...],
        dimension_numbers=(((1,), (1,)), ((), ())),
        preferred_element_type=jnp.float32)

    @pl.when(pl.program_id(2) == pl.num_programs(2) - 1)
    def _finalize():
        o_ref[...] = (acc_ref[...] + b_ref[...]).astype(o_ref.dtype)


def _linear_tiled(x, w, b, *, tm_cap=512, tn_cap=1024, tk_cap=1024):
    M, K = x.shape
    N = w.shape[0]
    tm = M if M <= tm_cap else tm_cap          # partial last M block masked on store
    tn = _pick_tile(N, tn_cap)                 # lane-dense, 256-multiple output tiles
    tk = _pick_tile(K, tk_cap)                 # reduction tiles must divide K exactly
    grid = (pl.cdiv(M, tm), N // tn, K // tk)
    return pl.pallas_call(
        _linear_tiled_kernel,
        grid=grid,
        in_specs=[
            pl.BlockSpec((tm, tk), lambda i, j, k: (i, k)),
            pl.BlockSpec((tn, tk), lambda i, j, k: (j, k)),
            pl.BlockSpec((1, tn), lambda i, j, k: (0, j)),
        ],
        out_specs=pl.BlockSpec((tm, tn), lambda i, j, k: (i, j)),
        out_shape=jax.ShapeDtypeStruct((M, N), x.dtype),
        scratch_shapes=[pltpu.VMEM((tm, tn), jnp.float32)],
        compiler_params=pltpu.CompilerParams(
            dimension_semantics=("parallel", "parallel", "arbitrary"),
            vmem_limit_bytes=_VMEM_LIMIT),
    )(x, w, b.astype(jnp.float32).reshape(1, N))


def pallas_linear(x, w, b, *, n_chunks=1):
    """y = x @ w.T + b (torch.nn.functional.linear).

    When the weight fits the VMEM budget the weight-resident single-pass GEMM is used
    (weight read from HBM once, no K reduction axis); otherwise a tiled, pipelined GEMM.
    With n_chunks > 1 the output is returned as (n_chunks, M, N // n_chunks) so fused
    QKV / KV projections produce contiguous per-operand tensors.
    """
    M, K = x.shape
    N = w.shape[0]
    assert w.shape[1] == K and b.shape == (N,)
    assert N % n_chunks == 0
    dsize = jnp.dtype(x.dtype).itemsize
    tm = _resident_row_tile(M, K, N, dsize, _RESIDENT_BUDGET)
    if tm is not None:
        return _linear_resident(x, w, b, tm, n_chunks=n_chunks)
    y = _linear_tiled(x, w, b)
    if n_chunks == 1:
        return y
    # TODO(synk): rare huge-weight fallback pays one extra HBM pass for the re-layout.
    width = N // n_chunks
    return jnp.stack([y[:, c * width:(c + 1) * width] for c in range(n_chunks)], axis=0)


# -------------------- flash-style multi-head attention ----------------------- #

def _mha_kernel(q_ref, k_ref, v_ref, o_ref, m_sc, l_sc, acc_sc, *,
                num_heads, head_dim, scale):
    # q_ref/o_ref: (tq, E); k_ref/v_ref: (tkv, E) with heads folded into the lane dim.
    ki = pl.program_id(2)

    @pl.when(ki == 0)
    def _init():
        m_sc[...] = jnp.full(m_sc.shape, -jnp.inf, m_sc.dtype)
        l_sc[...] = jnp.zeros(l_sc.shape, l_sc.dtype)
        acc_sc[...] = jnp.zeros(acc_sc.shape, acc_sc.dtype)

    # Static unroll over heads; each head reads/writes its own scratch slot so per-head
    # chains stay short.  (For num_heads >= 8 with head_dim % 128 == 0 a head grid axis
    # would bound live ranges further.)
    for h in range(num_heads):
        lo = h * head_dim
        qh = q_ref[:, lo:lo + head_dim] * scale              # scale folded into q
        kh = k_ref[:, lo:lo + head_dim]                      # (tkv, hd)
        vh = v_ref[:, lo:lo + head_dim]                      # (tkv, hd)
        # Contract the hd axis of q and k directly (no k transpose on the XLU).
        s = lax.dot_general(qh, kh,
                            dimension_numbers=(((1,), (1,)), ((), ())),
                            preferred_element_type=jnp.float32)   # (tq, tkv)
        m_prev = m_sc[h]                                     # (tq, 1)
        m_new = jnp.maximum(m_prev, jnp.max(s, axis=-1, keepdims=True))
        alpha = jnp.exp(m_prev - m_new)
        p = jnp.exp(s - m_new)                               # (tq, tkv)
        l_sc[h] = alpha * l_sc[h] + jnp.sum(p, axis=-1, keepdims=True)
        acc_sc[h] = alpha * acc_sc[h] + lax.dot_general(
            p.astype(vh.dtype), vh,
            dimension_numbers=(((1,), (0,)), ((), ())),
            preferred_element_type=jnp.float32)              # (tq, hd)
        m_sc[h] = m_new

    @pl.when(ki == pl.num_programs(2) - 1)
    def _finalize():
        parts = []
        for h in range(num_heads):
            inv = pl.reciprocal(l_sc[h], approx=True)        # EUP reciprocal, (tq, 1)
            parts.append(acc_sc[h] * inv)
        # Single lane-dense (tq, E) store instead of num_heads masked partial stores.
        o_ref[...] = jnp.concatenate(parts, axis=-1).astype(o_ref.dtype)


def pallas_mha_attention(q_arr, k_arr, v_arr, *, embed_dim, num_heads,
                         q_idx=0, k_idx=0, v_idx=0, tq_cap=512, tkv_cap=128):
    """Batch-major attention with heads folded into the last dim.

    q_arr: (Cq, B, L, E), k_arr/v_arr: (Ck/Cv, B, S, E); *_idx selects the chunk of a
    fused QKV / KV projection output (each chunk is a contiguous (B, *, E) tensor), so
    the fused result is consumed in place via BlockSpec leading indices.
    Grid = (batch, q tiles, kv tiles) with online softmax along the kv axis.
    """
    _, B, L, E = q_arr.shape
    S = k_arr.shape[2]
    assert E == embed_dim and E % num_heads == 0
    hd = E // num_heads

    tq_cap_eff = tq_cap
    if B == 1 and L >= 16:
        # v7x has 2 TensorCores: guarantee >= 2 parallel q tiles when B == 1.
        tq_cap_eff = min(tq_cap, max(8, ((L // 2) // 8) * 8))
    tq = _pick_tile(L, tq_cap_eff, (8,))
    tkv = _pick_tile(S, tkv_cap, (8,))     # must divide S (kv axis is a reduction)
    grid = (B, L // tq, S // tkv)

    kernel = functools.partial(_mha_kernel, num_heads=num_heads, head_dim=hd,
                               scale=1.0 / math.sqrt(hd))
    return pl.pallas_call(
        kernel,
        grid=grid,
        in_specs=[
            pl.BlockSpec((None, None, tq, E), lambda b, qi, ki: (q_idx, b, qi, 0)),
            pl.BlockSpec((None, None, tkv, E), lambda b, qi, ki: (k_idx, b, ki, 0)),
            pl.BlockSpec((None, None, tkv, E), lambda b, qi, ki: (v_idx, b, ki, 0)),
        ],
        out_specs=pl.BlockSpec((None, tq, E), lambda b, qi, ki: (b, qi, 0)),
        out_shape=jax.ShapeDtypeStruct((B, L, E), q_arr.dtype),
        scratch_shapes=[
            pltpu.VMEM((num_heads, tq, 1), jnp.float32),    # running max
            pltpu.VMEM((num_heads, tq, 1), jnp.float32),    # running denominator
            pltpu.VMEM((num_heads, tq, hd), jnp.float32),   # running numerator
        ],
        compiler_params=pltpu.CompilerParams(
            dimension_semantics=("parallel", "parallel", "arbitrary"),
            vmem_limit_bytes=_VMEM_LIMIT),
    )(q_arr, k_arr, v_arr)


# ------------------------------ module forward ------------------------------- #

def init_params(key, embed_dim):
    """Parameter init mirroring DynamicGatedMultiheadAttention.__init__/_reset_parameters."""
    k1, k2 = jax.random.split(key)
    bound_in = math.sqrt(6.0 / (embed_dim + 3 * embed_dim))   # xavier_uniform_ on (3E, E)
    in_proj_weight = jax.random.uniform(
        k1, (3 * embed_dim, embed_dim), jnp.float32, -bound_in, bound_in)
    in_proj_bias = jnp.zeros((3 * embed_dim,), jnp.float32)   # constant_(..., 0.)
    bound_out = 1.0 / math.sqrt(embed_dim)                    # nn.Linear default
    out_proj_weight = jax.random.uniform(
        k2, (embed_dim, embed_dim), jnp.float32, -bound_out, bound_out)
    out_proj_bias = jnp.zeros((embed_dim,), jnp.float32)      # constant_(..., 0.)
    # TODO(synk): DGLLayer gate-predictor MLP / LayerNorm params only pick top-k channel
    # indices; with top_r=1.0 every channel is selected and the scatter restores
    # canonical order, so the gate path has no effect on the output and is omitted.
    return dict(in_proj_weight=in_proj_weight, in_proj_bias=in_proj_bias,
                out_proj_weight=out_proj_weight, out_proj_bias=out_proj_bias)


def dynamic_gated_mha_forward(query, key, value, params, num_heads,
                              *, compute_dtype=jnp.float32):
    """query:(L,B,E), key/value:(S,B,E) (batch_first=False). Returns ((L,B,E), None).

    Note: on v5e keep compute_dtype=float32 (no bf16 VPU/EUP there); bf16 pays off on
    v6e/v7x where halving GEMM input bytes matters.
    """
    tgt_len, bsz, E = query.shape
    src_len = key.shape[0]
    assert E % num_heads == 0

    w_in = params["in_proj_weight"].astype(compute_dtype)     # (3E, E)
    b_in = params["in_proj_bias"]                             # kept f32 (f32 accumulate)
    w_out = params["out_proj_weight"].astype(compute_dtype)
    b_out = params["out_proj_bias"]

    # Batch-major activations so batch is a leading grid axis everywhere.
    # TODO(synk): a batch_first caller could keep batch-major end to end and drop both
    # of these HBM transpose passes; the module is fixed to batch_first=False.
    q_in = jnp.transpose(query, (1, 0, 2)).astype(compute_dtype)       # (B, L, E)

    if (query is key) and (key is value):
        # Self-attention: one fused QKV projection, written as 3 contiguous chunks.
        qkv = pallas_linear(q_in.reshape(bsz * tgt_len, E), w_in, b_in, n_chunks=3)
        qkv = qkv.reshape(3, bsz, tgt_len, E)
        q_arr = k_arr = v_arr = qkv                 # consumed in place by attention
        q_idx, k_idx, v_idx = 0, 1, 2
    else:
        w_q, w_k, w_v = jnp.split(w_in, 3, axis=0)
        b_q, b_k, b_v = jnp.split(b_in, 3)
        q_arr = pallas_linear(q_in.reshape(bsz * tgt_len, E), w_q, b_q)
        q_arr = q_arr.reshape(1, bsz, tgt_len, E)
        q_idx = 0
        k_in = jnp.transpose(key, (1, 0, 2)).astype(compute_dtype)     # (B, S, E)
        if key is value:
            # Fused KV projection over the shared source, 2 contiguous chunks.
            kv = pallas_linear(k_in.reshape(bsz * src_len, E),
                               jnp.concatenate([w_k, w_v], axis=0),
                               jnp.concatenate([b_k, b_v]), n_chunks=2)
            k_arr = v_arr = kv.reshape(2, bsz, src_len, E)
            k_idx, v_idx = 0, 1
        else:
            v_in = jnp.transpose(value, (1, 0, 2)).astype(compute_dtype)
            k_arr = pallas_linear(k_in.reshape(bsz * src_len, E), w_k, b_k)
            k_arr = k_arr.reshape(1, bsz, src_len, E)
            v_arr = pallas_linear(v_in.reshape(bsz * src_len, E), w_v, b_v)
            v_arr = v_arr.reshape(1, bsz, src_len, E)
            k_idx = v_idx = 0

    # Heads are split/merged inside the kernel; output is (B, L, E) lane-dense.
    attn = pallas_mha_attention(q_arr, k_arr, v_arr, embed_dim=E, num_heads=num_heads,
                                q_idx=q_idx, k_idx=k_idx, v_idx=v_idx)

    out = pallas_linear(attn.reshape(bsz * tgt_len, E), w_out, b_out)
    out = jnp.transpose(out.reshape(bsz, tgt_len, E), (1, 0, 2))        # back to (L, B, E)
    return out, None


# ------------------------------- reference ----------------------------------- #

def _reference_forward(query, key, value, params, num_heads):
    """Pure-JAX f32 reference for checking the Pallas path."""
    tgt_len, bsz, E = query.shape
    src_len = key.shape[0]
    hd = E // num_heads
    w_q, w_k, w_v = jnp.split(params["in_proj_weight"], 3, axis=0)
    b_q, b_k, b_v = jnp.split(params["in_proj_bias"], 3)
    q = query @ w_q.T + b_q
    k = key @ w_k.T + b_k
    v = value @ w_v.T + b_v
    qh = q.reshape(tgt_len, bsz, num_heads, hd).transpose(1, 2, 0, 3)
    kh = k.reshape(src_len, bsz, num_heads, hd).transpose(1, 2, 0, 3)
    vh = v.reshape(src_len, bsz, num_heads, hd).transpose(1, 2, 0, 3)
    s = jnp.einsum("bhld,bhsd->bhls", qh, kh) / math.sqrt(hd)
    a = jax.nn.softmax(s, axis=-1)
    o = jnp.einsum("bhls,bhsd->bhld", a, vh)
    o = o.transpose(2, 0, 1, 3).reshape(tgt_len, bsz, E)
    return o @ params["out_proj_weight"].T + params["out_proj_bias"]


# --------------------------------- driver ------------------------------------ #

if __name__ == "__main__":
    embed_dim = 128
    num_heads = 4
    tgt_len, src_len, bsz = 16, 8, 2

    root = jax.random.PRNGKey(0)
    k_param, k_x, k_kv, k_b1, k_b2 = jax.random.split(root, 5)

    params = init_params(k_param, embed_dim)
    # Use non-zero biases (as in a trained model) so the bias path is actually checked.
    params["in_proj_bias"] = 0.1 * jax.random.normal(k_b1, (3 * embed_dim,), jnp.float32)
    params["out_proj_bias"] = 0.1 * jax.random.normal(k_b2, (embed_dim,), jnp.float32)

    x = jax.random.normal(k_x, (tgt_len, bsz, embed_dim), jnp.float32)
    src = jax.random.normal(k_kv, (src_len, bsz, embed_dim), jnp.float32)

    # Case 1: self-attention (query is key is value) -> fused chunked QKV projection.
    out1, attn_w = dynamic_gated_mha_forward(x, x, x, params, num_heads)
    out1 = jax.block_until_ready(out1)
    ref1 = _reference_forward(x, x, x, params, num_heads)
    assert out1.shape == (tgt_len, bsz, embed_dim)
    assert attn_w is None
    assert jnp.allclose(out1, ref1, atol=1e-2, rtol=1e-2)

    # Case 2: cross-attention with key is value -> fused chunked KV projection.
    out2, _ = dynamic_gated_mha_forward(x, src, src, params, num_heads)
    out2 = jax.block_until_ready(out2)
    ref2 = _reference_forward(x, src, src, params, num_heads)
    assert jnp.allclose(out2, ref2, atol=1e-2, rtol=1e-2)

    # Case 3: bf16 activation path (v6e/v7x fast path), loose tolerance vs f32 reference.
    out3, _ = dynamic_gated_mha_forward(x, x, x, params, num_heads,
                                        compute_dtype=jnp.bfloat16)
    out3 = jax.block_until_ready(out3).astype(jnp.float32)
    assert jnp.allclose(out3, ref1, atol=1.5e-1, rtol=1.5e-1)

    print("KERNEL_OK")
</pallas_src>

<mosaic_0001>
module attributes {stable_mosaic.version = 11 : i64} {
  func.func @_linear_resident_chunked_kernel(%arg0: i32, %arg1: memref<32x128xf32, #tpu.memory_space<vmem>>, %arg2: memref<384x128xf32, #tpu.memory_space<vmem>>, %arg3: memref<1x384xf32, #tpu.memory_space<vmem>>, %arg4: memref<3x32x128xf32, #tpu.memory_space<vmem>>) attributes {dimension_semantics = [#tpu.dimension_semantics<parallel>], iteration_bounds = array<i64: 1>, scalar_prefetch = 0 : i64, scratch_operands = 0 : i64, tpu.core_type = #tpu.core_type<tc>, window_params = [{transform_indices = @transform_0, window_bounds = array<i64: 32, 128>}, {pipeline_mode = #tpu.pipeline_mode<synchronous>, transform_indices = @transform_1, window_bounds = array<i64: 384, 128>}, {pipeline_mode = #tpu.pipeline_mode<synchronous>, transform_indices = @transform_2, window_bounds = array<i64: 1, 384>}, {transform_indices = @transform_3, window_bounds = array<i64: 3, 32, 128>}]} {
    %c0 = arith.constant 0 : index
    %c0_0 = arith.constant 0 : index
    %0 = vector.load %arg1[%c0, %c0_0] : memref<32x128xf32, #tpu.memory_space<vmem>>, vector<32x128xf32>
    %c0_1 = arith.constant 0 : index
    %c0_2 = arith.constant 0 : index
    %1 = vector.load %arg2[%c0_1, %c0_2] : memref<384x128xf32, #tpu.memory_space<vmem>>, vector<384x128xf32>
    %cst = arith.constant dense<0.000000e+00> : vector<32x384xf32>
    %2 = tpu.matmul %0, %1, %cst {dimension_numbers = #tpu.dot_dimension_numbers<[1], [1], [0], [0], [0, 0, 1, 0], [], []>} : vector<32x128xf32>, vector<384x128xf32>, vector<32x384xf32> -> vector<32x384xf32>
    %c0_3 = arith.constant 0 : index
    %c0_4 = arith.constant 0 : index
    %3 = vector.load %arg3[%c0_3, %c0_4] : memref<1x384xf32, #tpu.memory_space<vmem>>, vector<1x384xf32>
    %4 = vector.broadcast %3 : vector<1x384xf32> to vector<32x384xf32>
    %5 = arith.addf %2, %4 : vector<32x384xf32>
    %6 = vector.extract_strided_slice %5 {offsets = [0, 0], sizes = [32, 128], strides = [1, 1]} : vector<32x384xf32> to vector<32x128xf32>
    %c0_5 = arith.constant 0 : index
    %c0_6 = arith.constant 0 : index
    %c0_7 = arith.constant 0 : index
    %7 = vector.load %arg4[%c0_5, %c0_6, %c0_7] : memref<3x32x128xf32, #tpu.memory_space<vmem>>, vector<1x32x128xf32>
    %8 = vector.shape_cast %7 : vector<1x32x128xf32> to vector<32x128xf32>
    %9 = vector.shape_cast %6 : vector<32x128xf32> to vector<1x32x128xf32>
    tpu.vector_store %arg4[%c0_5, %c0_6, %c0_7], %9 {strides = array<i32>} : memref<3x32x128xf32, #tpu.memory_space<vmem>>, vector<1x32x128xf32>,
    %10 = vector.extract_strided_slice %5 {offsets = [0, 128], sizes = [32, 128], strides = [1, 1]} : vector<32x384xf32> to vector<32x128xf32>
    %c1 = arith.constant 1 : index
    %c0_8 = arith.constant 0 : index
    %c0_9 = arith.constant 0 : index
    %11 = vector.load %arg4[%c1, %c0_8, %c0_9] : memref<3x32x128xf32, #tpu.memory_space<vmem>>, vector<1x32x128xf32>
    %12 = vector.shape_cast %11 : vector<1x32x128xf32> to vector<32x128xf32>
    %13 = vector.shape_cast %10 : vector<32x128xf32> to vector<1x32x128xf32>
    tpu.vector_store %arg4[%c1, %c0_8, %c0_9], %13 {strides = array<i32>} : memref<3x32x128xf32, #tpu.memory_space<vmem>>, vector<1x32x128xf32>,
    %14 = vector.extract_strided_slice %5 {offsets = [0, 256], sizes = [32, 128], strides = [1, 1]} : vector<32x384xf32> to vector<32x128xf32>
    %c2 = arith.constant 2 : index
    %c0_10 = arith.constant 0 : index
    %c0_11 = arith.constant 0 : index
    %15 = vector.load %arg4[%c2, %c0_10, %c0_11] : memref<3x32x128xf32, #tpu.memory_space<vmem>>, vector<1x32x128xf32>
    %16 = vector.shape_cast %15 : vector<1x32x128xf32> to vector<32x128xf32>
    %17 = vector.shape_cast %14 : vector<32x128xf32> to vector<1x32x128xf32>
    tpu.vector_store %arg4[%c2, %c0_10, %c0_11], %17 {strides = array<i32>} : memref<3x32x128xf32, #tpu.memory_space<vmem>>, vector<1x32x128xf32>,
    return
  }
  func.func @transform_0(%arg0: i32) -> (i32, i32) {
    %c0_i32 = arith.constant 0 : i32
    %c0_i32_0 = arith.constant 0 : i32
    return %arg0, %c0_i32 : i32, i32
  }
  func.func @transform_1(%arg0: i32) -> (i32, i32) {
    %c0_i32 = arith.constant 0 : i32
    %c0_i32_0 = arith.constant 0 : i32
    %c0_i32_1 = arith.constant 0 : i32
    return %c0_i32, %c0_i32_0 : i32, i32
  }
  func.func @transform_2(%arg0: i32) -> (i32, i32) {
    %c0_i32 = arith.constant 0 : i32
    %c0_i32_0 = arith.constant 0 : i32
    %c0_i32_1 = arith.constant 0 : i32
    return %c0_i32, %c0_i32_0 : i32, i32
  }
  func.func @transform_3(%arg0: i32) -> (i32, i32, i32) {
    %c0_i32 = arith.constant 0 : i32
    %c0_i32_0 = arith.constant 0 : i32
    %c0_i32_1 = arith.constant 0 : i32
    return %c0_i32, %arg0, %c0_i32_0 : i32, i32, i32
  }
}

</mosaic_0001>

<bundles_post_ra>
// kernel: tpu_custom_call.1
= control target key start
LH: loop header
LB: loop body
LE: loop exit
PB: predicated region body
PF: predicated region fallthrough
CT: control target
= control target key end

     0   :  { %8 = vsyncpa [#allocation3], 0  ;;  %s538_s0 = inlined_call_operand.hbm [shape: f32[32,128], index: 0, kind: input, shape index: {}]   ;;  %s539_s1 = inlined_call_operand.hbm [shape: f32[384,128], index: 1, kind: input, shape index: {}]   ;;  %s540_s2 = inlined_call_operand.vmem [shape: f32[1,384], index: 2, kind: input, shape index: {}]   ;;  %s541_s3 = inlined_call_operand.hbm [shape: f32[3,32,128], index: 3, kind: output, shape index: {}]  }
   0x1   :  { %9 = vsyncpa [#allocation6], 0 }
   0x2   :  { %10 = vsyncpa [#allocation4], 0  ;;  %s487_s12 = smov [#allocation2]  }
   0x3   :  { %s16_s13 = sshll.u32 %s487_s12, 4  ;;  %s17_s13 = int_to_ptr.vmem [resolvable:$true] %s16_s13 }
   0x4   :  { %s429_s14 = scalar_lea.vmem %s17_s13, 512  ;;  %p434_p1 = scmp.lt.s32.totalorder %s17_s13, %s17_s13 }
   0x5   :  { %p430_p0 = scmp.ne.s32.totalorder %s17_s13, %s429_s14  ;;  %p435_p2 = scmp.lt.s32.totalorder %s429_s14, %s429_s14 }
   0x7   :  { %p436_p3 = por %p435_p2, %p434_p1 }
   0x9   :  { %p437_p4 = pnand %p436_p3, %p430_p0 }
   0xb   :  { %440 = shalt.err (!%p437_p4)
}
   0xc   :  { %s488_s15 = smov 128   ;;  %s489_s16 = smov 8  }
   0xd   :  { %22 = dma.hbm_to_vmem [thread:$0]  %s538_s0, 512, %s17_s13, [#allocation3], %s488_s15, %s488_s15, %s489_s16  }
   0xe   :  { %s490_s19 = smov [#allocation5]  }
   0xf   :  { %s28_s20 = sshll.u32 %s490_s19, 4  ;;  %s29_s20 = int_to_ptr.vmem [resolvable:$true] %s28_s20 }
  0x10   :  { %s449_s21 = scalar_lea.vmem %s29_s20, 6144  ;;  %p454_p6 = scmp.lt.s32.totalorder %s29_s20, %s29_s20 }
  0x11   :  { %p450_p5 = scmp.ne.s32.totalorder %s29_s20, %s449_s21  ;;  %p455_p7 = scmp.lt.s32.totalorder %s449_s21, %s449_s21 }
  0x13   :  { %p456_p8 = por %p455_p7, %p454_p6 }
  0x15   :  { %p457_p9 = pnand %p456_p8, %p450_p5 }
  0x17   :  { %460 = shalt.err (!%p457_p9)
}
  0x18   :  { %34 = dma.hbm_to_vmem [thread:$0]  %s539_s1, 6144, %s29_s20, [#allocation6], %s488_s15, %s488_s15, %s489_s16  }
  0x19   :  { %481 = dma.done.wait [#allocation3], 512  }
  0x1a   :  { %482 = vsyncadd [#allocation3], 4294966784 }
  0x1b   :  { %483 = dma.done.wait [#allocation6], 6144  }
  0x1c   :  { %484 = vsyncadd [#allocation6], 4294961152  ;;  %v78_v0 = vld [vmem:[#allocation5 + $0xf8] sm:$0xff]  ;;  %v77_v2 = vld [vmem:[#allocation5 + $0xf0] sm:$0xff]  ;;  %v97_v52 = vlaneseq }
  0x1d   :  { %v62_v1 = vld [vmem:[#allocation5 + $0x78] sm:$0xff]  ;;  %318 = vmatprep.subr.mxu0 %v78_v0  ;;  %v93_v4 = vld [vmem:[#allocation5 + $0x170] sm:$0xff]  ;;  %v76_v6 = vld [vmem:[#allocation5 + $0xe8] sm:$0xff] }
  0x1e   :  { %v94_v3 = vld [vmem:[#allocation5 + $0x178] sm:$0xff]  ;;  %319 = vmatpush3.xpose.msra.mxu0 %v62_v1  ;;  %v61_v5 = vld [vmem:[#allocation5 + $0x70] sm:$0xff]  ;;  %v92_v7 = vld [vmem:[#allocation5 + $0x168] sm:$0xff]  ;;  %v98_v53 = vshrl.u32 %v97_v52, 7 }
  0x1f   :  { %378 = vmatprep.subr.mxu1 %v94_v3  ;;  %320 = vmatprep.subr.mxu0 %v77_v2  ;;  %v60_v8 = vld [vmem:[#allocation5 + $0x68] sm:$0xff]  ;;  %v75_v9 = vld [vmem:[#allocation5 + $0xe0] sm:$0xff]  ;;  %v74_v12 = vld [vmem:[#allocation5 + $0xd8] sm:$0xff] }
  0x20   :  { %379 = vmatpush3.xpose.msra.mxu1 %v94_v3  ;;  %v91_v10 = vld [vmem:[#allocation5 + $0x160] sm:$0xff]  ;;  %v90_v13 = vld [vmem:[#allocation5 + $0x158] sm:$0xff]  ;;  %v73_v16 = vld [vmem:[#allocation5 + $0xd0] sm:$0xff]  ;;  %v99_v54 = vsub.s32 0, %v98_v53  ;;  %v107_v56 = vsub.s32 2, %v98_v53  ;;  %v103_v57 = vsub.s32 1, %v98_v53 }
  0x21   :  { %380 = vmatprep.subr.mxu1 %v93_v4  ;;  %v59_v11 = vld [vmem:[#allocation5 + $0x60] sm:$0xff]  ;;  %v58_v14 = vld [vmem:[#allocation5 + $0x58] sm:$0xff]  ;;  %v89_v17 = vld [vmem:[#allocation5 + $0x150] sm:$0xff] }
  0x22   :  { %321 = vmatpush3.xpose.msra.mxu0 %v61_v5  ;;  %v524_v15 = vld [vmem:[#allocation2] sm:$0xff]  ;;  %v57_v18 = vld [vmem:[#allocation5 + $0x50] sm:$0xff]  ;;  %v72_v19 = vld [vmem:[#allocation5 + $0xc8] sm:$0xff] }
  0x23   :  { %322 = vmatprep.subr.mxu0 %v76_v6  ;;  %350 = vmatprep.mubr.f32.mxu0 %v524_v15  ;;  %v88_v20 = vld [vmem:[#allocation5 + $0x148] sm:$0xff]  ;;  %v71_v22 = vld [vmem:[#allocation5 + $0xc0] sm:$0xff]  ;;  %v70_v25 = vld [vmem:[#allocation5 + $0xb8] sm:$0xff] }
  0x24   :  { %381 = vmatpush3.xpose.msra.mxu1 %v93_v4  ;;  %410 = vmatprep.mubr.f32.mxu1 %v524_v15  ;;  %v56_v21 = vld [vmem:[#allocation5 + $0x48] sm:$0xff]  ;;  %v87_v23 = vld [vmem:[#allocation5 + $0x140] sm:$0xff]  ;;  %v86_v26 = vld [vmem:[#allocation5 + $0x138] sm:$0xff] }
  0x25   :  { %382 = vmatprep.subr.mxu1 %v92_v7  ;;  %v55_v24 = vld [vmem:[#allocation5 + $0x40] sm:$0xff]  ;;  %v54_v27 = vld [vmem:[#allocation5 + $0x38] sm:$0xff]  ;;  %v69_v28 = vld [vmem:[#allocation5 + $0xb0] sm:$0xff] }
  0x26   :  { %323 = vmatpush3.xpose.msra.mxu0 %v60_v8  ;;  %v85_v29 = vld [vmem:[#allocation5 + $0x130] sm:$0xff]  ;;  %v68_v31 = vld [vmem:[#allocation5 + $0xa8] sm:$0xff]  ;;  %v67_v34 = vld [vmem:[#allocation5 + $0xa0] sm:$0xff] }
  0x27   :  { %324 = vmatprep.subr.mxu0 %v75_v9  ;;  %v53_v30 = vld [vmem:[#allocation5 + $0x30] sm:$0xff]  ;;  %v84_v32 = vld [vmem:[#allocation5 + $0x128] sm:$0xff]  ;;  %v83_v35 = vld [vmem:[#allocation5 + $0x120] sm:$0xff] }
  0x28   :  { %383 = vmatpush3.xpose.msra.mxu1 %v92_v7  ;;  %v52_v33 = vld [vmem:[#allocation5 + $0x28] sm:$0xff]  ;;  %v51_v36 = vld [vmem:[#allocation5 + $0x20] sm:$0xff]  ;;  %v66_v37 = vld [vmem:[#allocation5 + $0x98] sm:$0xff] }
  0x29   :  { %384 = vmatprep.subr.mxu1 %v91_v10  ;;  %v82_v38 = vld [vmem:[#allocation5 + $0x118] sm:$0xff]  ;;  %v65_v40 = vld [vmem:[#allocation5 + $0x90] sm:$0xff]  ;;  %v64_v43 = vld [vmem:[#allocation5 + $0x88] sm:$0xff] }
  0x2a   :  { %325 = vmatpush3.xpose.msra.mxu0 %v59_v11  ;;  %v50_v39 = vld [vmem:[#allocation5 + $0x18] sm:$0xff]  ;;  %v81_v41 = vld [vmem:[#allocation5 + $0x110] sm:$0xff]  ;;  %v80_v44 = vld [vmem:[#allocation5 + $0x108] sm:$0xff] }
  0x2b   :  { %326 = vmatprep.subr.mxu0 %v74_v12  ;;  %v49_v42 = vld [vmem:[#allocation5 + $0x10] sm:$0xff]  ;;  %v48_v45 = vld [vmem:[#allocation5 + $0x8] sm:$0xff]  ;;  %v63_v46 = vld [vmem:[#allocation5 + $0x80] sm:$0xff] }
  0x2c   :  { %385 = vmatpush3.xpose.msra.mxu1 %v91_v10  ;;  %v79_v47 = vld [vmem:[#allocation5 + $0x100] sm:$0xff]  ;;  %v44_v49 = vld [vmem:[#allocation2 + $0x8] sm:$0xff]  ;;  %v45_v50 = vld [vmem:[#allocation2 + $0x10] sm:$0xff] }
  0x2d   :  { %386 = vmatprep.subr.mxu1 %v90_v13  ;;  %v47_v48 = vld [vmem:[#allocation5] sm:$0xff]  ;;  %v46_v51 = vld [vmem:[#allocation2 + $0x18] sm:$0xff] }
  0x2e   :  { %327 = vmatpush3.xpose.msra.mxu0 %v58_v14  ;;  %v95_v55 = vld [vmem:[%s540_s2] sm:$0x7]  ;;  %s491_s2 = smov [#allocation7]  }
  0x2f   :  { %328 = vmatprep.subr.mxu0 %v73_v16  ;;  %v100_v58 = vrot.slane %v95_v55, %v99_v54  ;;  %v108_v59 = vrot.slane %v95_v55, %v107_v56  ;;  %v104_v60 = vrot.slane %v95_v55, %v103_v57  ;;  %s305_s24 = sshll.u32 %s491_s2, 4  ;;  %s306_s24 = int_to_ptr.vmem [resolvable:$true] %s305_s24 }
  0x30   :  { %387 = vmatpush3.xpose.msra.mxu1 %v90_v13  ;;  %s461_s25 = scalar_lea.vmem %s306_s24, 1536  ;;  %p466_p11 = scmp.lt.s32.totalorder %s306_s24, %s306_s24 }
  0x31   :  { %388 = vmatprep.subr.mxu1 %v89_v17  ;;  %p462_p10 = scmp.ne.s32.totalorder %s306_s24, %s461_s25  ;;  %p467_p12 = scmp.lt.s32.totalorder %s461_s25, %s461_s25 }
  0x32   :  { %329 = vmatpush3.xpose.msra.mxu0 %v57_v18 }
  0x33   :  { %330 = vmatprep.subr.mxu0 %v72_v19  ;;  %p468_p13 = por %p467_p12, %p466_p11 }
  0x34   :  { %389 = vmatpush3.xpose.msra.mxu1 %v89_v17 }
  0x35   :  { %390 = vmatprep.subr.mxu1 %v88_v20  ;;  %p469_p0 = pnand %p468_p13, %p462_p10 }
  0x36   :  { %331 = vmatpush3.xpose.msra.mxu0 %v56_v21 }
  0x37   :  { %332 = vmatprep.subr.mxu0 %v71_v22 }
  0x38   :  { %391 = vmatpush3.xpose.msra.mxu1 %v88_v20 }
  0x39   :  { %392 = vmatprep.subr.mxu1 %v87_v23 }
  0x3a   :  { %333 = vmatpush3.xpose.msra.mxu0 %v55_v24 }
  0x3b   :  { %334 = vmatprep.subr.mxu0 %v70_v25 }
  0x3c   :  { %393 = vmatpush3.xpose.msra.mxu1 %v87_v23 }
  0x3d   :  { %394 = vmatprep.subr.mxu1 %v86_v26 }
  0x3e   :  { %335 = vmatpush3.xpose.msra.mxu0 %v54_v27 }
  0x3f   :  { %336 = vmatprep.subr.mxu0 %v69_v28 }
  0x40   :  { %395 = vmatpush3.xpose.msra.mxu1 %v86_v26 }
  0x41   :  { %396 = vmatprep.subr.mxu1 %v85_v29 }
  0x42   :  { %337 = vmatpush3.xpose.msra.mxu0 %v53_v30 }
  0x43   :  { %338 = vmatprep.subr.mxu0 %v68_v31 }
  0x44   :  { %397 = vmatpush3.xpose.msra.mxu1 %v85_v29 }
  0x45   :  { %398 = vmatprep.subr.mxu1 %v84_v32 }
  0x46   :  { %339 = vmatpush3.xpose.msra.mxu0 %v52_v33 }
  0x47   :  { %340 = vmatprep.subr.mxu0 %v67_v34 }
  0x48   :  { %399 = vmatpush3.xpose.msra.mxu1 %v84_v32 }
  0x49   :  { %400 = vmatprep.subr.mxu1 %v83_v35 }
  0x4a   :  { %341 = vmatpush3.xpose.msra.mxu0 %v51_v36 }
  0x4b   :  { %342 = vmatprep.subr.mxu0 %v66_v37 }
  0x4c   :  { %401 = vmatpush3.xpose.msra.mxu1 %v83_v35 }
  0x4d   :  { %402 = vmatprep.subr.mxu1 %v82_v38 }
  0x4e   :  { %343 = vmatpush3.xpose.msra.mxu0 %v50_v39 }
  0x4f   :  { %344 = vmatprep.subr.mxu0 %v65_v40 }
  0x50   :  { %403 = vmatpush3.xpose.msra.mxu1 %v82_v38 }
  0x51   :  { %404 = vmatprep.subr.mxu1 %v81_v41 }
  0x52   :  { %345 = vmatpush3.xpose.msra.mxu0 %v49_v42 }
  0x53   :  { %346 = vmatprep.subr.mxu0 %v64_v43 }
  0x54   :  { %405 = vmatpush3.xpose.msra.mxu1 %v81_v41 }
  0x55   :  { %406 = vmatprep.subr.mxu1 %v80_v44 }
  0x56   :  { %347 = vmatpush3.xpose.msra.mxu0 %v48_v45 }
  0x57   :  { %348 = vmatprep.subr.mxu0 %v63_v46 }
  0x58   :  { %407 = vmatpush3.xpose.msra.mxu1 %v80_v44 }
  0x59   :  { %408 = vmatprep.subr.mxu1 %v79_v47 }
  0x5a   :  { %349 = vmatpush3.xpose.msra.mxu0 %v47_v48 }
  0x5c   :  { %409 = vmatpush3.xpose.msra.mxu1 %v79_v47 }
  0x5d   :  { %351 = vmatmul.mubr.f32.vlgmr.msra.gmra.mxu0 %v524_v15 }
  0x5e   :  { %352 = vmatprep.mubr.f32.mxu0 %v44_v49 }
  0x5f   :  { %411 = vmatmul.mubr.f32.vlgmr.msra.gmra.mxu1 %v44_v49 }
  0x60   :  { %413 = vmatprep.mubr.f32.mxu1 %v45_v50 }
  0x61   :  { %353 = vmatmul.mubr.f32.gmra.mxu0 %v44_v49 }
  0x62   :  { %354 = vmatprep.mubr.f32.mxu0 %v45_v50 }
  0x63   :  { %414 = vmatmul.mubr.f32.gmra.mxu1 %v46_v51 }
  0x65   :  { %355 = vmatmul.mubr.f32.gmra.mxu0 %v45_v50 }
  0x66   :  { %356 = vmatprep.mubr.f32.mxu0 %v46_v51 }
  0x69   :  { %357 = vmatmul.mubr.f32.gmra.mxu0 %v46_v51 }
 0x11d   :  { %v178_v61 = vpop.f32.mrf.mxu0 }
 0x11e   :  { %v179_v62 = vadd.f32 %v178_v61, %v100_v58 }
 0x11f   :  { %v412_v63 = vpop.f32.mrf.mxu1  ;;  %v180_v0 = vpop.f32.mrf.mxu0 }
 0x120   :  { %v273_v1 = vadd.f32 %v412_v63, %v108_v59  ;;  %286 = vst [vmem:[#allocation7] sm:$0xff] %v179_v62  ;;  %v181_v2 = vadd.f32 %v180_v0, %v104_v60 }
 0x121   :  { %v267_v3 = vpop.f32.mrf.mxu1  ;;  %v184_v4 = vpop.f32.mrf.mxu0 }
 0x122   :  { %297 = vst [vmem:[#allocation7 + $0x48] sm:$0xff] %v273_v1  ;;  %v268_v5 = vadd.f32 %v267_v3, %v108_v59  ;;  %291 = vst [vmem:[#allocation7 + $0x20] sm:$0xff] %v181_v2  ;;  %v185_v6 = vadd.f32 %v184_v4, %v100_v58 }
 0x123   :  { %v415_v7 = vpop.f32.mrf.mxu1  ;;  %v186_v8 = vpop.f32.mrf.mxu0 }
 0x124   :  { %296 = vst [vmem:[#allocation7 + $0x40] sm:$0xff] %v268_v5  ;;  %v283_v9 = vadd.f32 %v415_v7, %v108_v59  ;;  %287 = vst [vmem:[#allocation7 + $0x8] sm:$0xff] %v185_v6  ;;  %v187_v10 = vadd.f32 %v186_v8, %v104_v60 }
 0x125   :  { %v277_v11 = vpop.f32.mrf.mxu1  ;;  %v190_v12 = vpop.f32.mrf.mxu0 }
 0x126   :  { %299 = vst [vmem:[#allocation7 + $0x58] sm:$0xff] %v283_v9  ;;  %v278_v13 = vadd.f32 %v277_v11, %v108_v59  ;;  %292 = vst [vmem:[#allocation7 + $0x28] sm:$0xff] %v187_v10  ;;  %v191_v14 = vadd.f32 %v190_v12, %v100_v58 }
 0x127   :  { %v192_v15 = vpop.f32.mrf.mxu0 }
 0x128   :  { %298 = vst [vmem:[#allocation7 + $0x50] sm:$0xff] %v278_v13  ;;  %288 = vst [vmem:[#allocation7 + $0x10] sm:$0xff] %v191_v14  ;;  %v193_v16 = vadd.f32 %v192_v15, %v104_v60 }
 0x129   :  { %v196_v17 = vpop.f32.mrf.mxu0 }
 0x12a   :  { %293 = vst [vmem:[#allocation7 + $0x30] sm:$0xff] %v193_v16  ;;  %v197_v18 = vadd.f32 %v196_v17, %v100_v58 }
 0x12b   :  { %v198_v19 = vpop.f32.mrf.mxu0 }
 0x12c   :  { %289 = vst [vmem:[#allocation7 + $0x18] sm:$0xff] %v197_v18  ;;  %v199_v20 = vadd.f32 %v198_v19, %v104_v60 }
 0x12e   :  { %294 = vst [vmem:[#allocation7 + $0x38] sm:$0xff] %v199_v20 }
 0x12f   :  { %472 = shalt.err (!%p469_p0)
}
 0x130   :  { %311 = dma.vmem_to_hbm [thread:$0]  %s306_s24, 1536, %s541_s3, [#allocation4], %s488_s15, %s488_s15, %s489_s16  }
 0x131   :  { %485 = dma.done.wait [#allocation4], 1536  }
 0x132   :  { %486 = vsyncadd [#allocation4], 4294965760 }
 0x133   :  { %315 = vsyncpa [#allocation3], 1 }
 0x134   :  { %316 = vsyncpa [#allocation6], 1 }
 0x135   :  { %317 = vsyncpa [#allocation4], 1 }

</bundles_post_ra>
